<compile_context>
chip_gen: v5e
topology: v5e:2x2
jax: 0.10.0
libtpu: 0.0.40
codegen_flags: <defaults>
</compile_context>

<pallas_src>
import functools
import math

import jax
import jax.numpy as jnp
import numpy as np
from jax import lax
from jax.experimental import pallas as pl
from jax.experimental.pallas import tpu as pltpu


def _mhsa_kernel(q_ref, k_ref, v_ref,
                 wq_ref, bq_ref, wk_ref, bk_ref, wv_ref, bv_ref,
                 wo_ref, bo_ref,
                 out_ref, attn_ref,
                 qp_ref, kp_ref, vp_ref, ctx_ref,
                 *, num_heads, d_head, batch_block, compute_dtype):
    cd = compute_dtype
    f32 = jnp.float32

    # Hoist weight/bias loads out of all loops (JAX does not CSE broadcasts).
    wq = wq_ref[...].astype(cd)
    wk = wk_ref[...].astype(cd)
    wv = wv_ref[...].astype(cd)
    wo = wo_ref[...].astype(cd)
    bq = bq_ref[...]
    bk = bk_ref[...]
    bv = bv_ref[...]
    bo = bo_ref[...]

    # Fold the 1/sqrt(d_head) attention scale into the Q projection once.
    scale = f32(1.0 / math.sqrt(d_head))

    # Per-batch-row 2D projections (MXU), written into VMEM scratch so the
    # head loop below can use batched dots and live ranges stay bounded.
    for b in range(batch_block):           # static, small
        qb = q_ref[b].astype(cd)           # [S, D]
        kb = k_ref[b].astype(cd)
        vb = v_ref[b].astype(cd)
        qp_ref[b] = (jnp.dot(qb, wq, preferred_element_type=f32) + bq) * scale
        kp_ref[b] = jnp.dot(kb, wk, preferred_element_type=f32) + bk
        vp_ref[b] = jnp.dot(vb, wv, preferred_element_type=f32) + bv

    # Contract last dims directly (no explicit transpose); batch over dim 0.
    dn_qk = (((2,), (2,)), ((0,), (0,)))   # bqd,bkd->bqk
    dn_av = (((2,), (1,)), ((0,), (0,)))   # bqk,bkd->bqd

    for h in range(num_heads):             # static unrolled loop over heads
        lo = h * d_head
        qh = qp_ref[:, :, lo:lo + d_head]  # [Bb, S, dh]
        kh = kp_ref[:, :, lo:lo + d_head]
        vh = vp_ref[:, :, lo:lo + d_head]

        # TODO(synk): optional additive mask (mask * -1e9) not wired in; the
        # reference module's default mask=None path is implemented.
        logits = lax.dot_general(qh.astype(cd), kh.astype(cd), dn_qk,
                                 preferred_element_type=f32)      # [Bb,S,S]

        # Softmax (kept in f32 on the VPU/EUP).
        m = jnp.max(logits, axis=-1, keepdims=True)
        e = jnp.exp(logits - m)
        s = jnp.sum(e, axis=-1, keepdims=True)
        r = pl.reciprocal(s, approx=True)          # EUP vrcp (free-ish slot)
        r = r * (2.0 - s * r)                      # one Newton step -> ~f32 accuracy
        attn = e * r

        attn_ref[:, h] = attn.astype(attn_ref.dtype)
        # Write this head's context at its static lane offset (no concatenate).
        ctx_ref[:, :, lo:lo + d_head] = lax.dot_general(
            attn.astype(cd), vh.astype(cd), dn_av, preferred_element_type=f32)

    # Output projection (dense), per batch row.
    for b in range(batch_block):
        out = jnp.dot(ctx_ref[b].astype(cd), wo, preferred_element_type=f32) + bo
        out_ref[b] = out.astype(out_ref.dtype)


def multi_head_self_attention(q, k, v, params, num_heads, *,
                              batch_block=None, compute_dtype=jnp.float32):
    """q, k, v: [B, S, d_model] float32. Returns (output, attn_weights)."""
    B, S, D = q.shape
    assert D % num_heads == 0
    d_head = D // num_heads
    wq, bq, wk, bk, wv, bv, wo, bo = params
    bq = bq.reshape(1, D)
    bk = bk.reshape(1, D)
    bv = bv.reshape(1, D)
    bo = bo.reshape(1, D)

    # Small problems: whole batch in a single grid step. For large B/S pick a
    # divisor of B so each step's blocks + scratch still fit VMEM.
    if batch_block is None:
        batch_block = B
    assert B % batch_block == 0
    num_blocks = B // batch_block

    kernel = functools.partial(
        _mhsa_kernel, num_heads=num_heads, d_head=d_head,
        batch_block=batch_block, compute_dtype=compute_dtype)

    batched = lambda: pl.BlockSpec((batch_block, S, D), lambda i: (i, 0, 0))
    full2d = lambda shp: pl.BlockSpec(shp, lambda i: (0, 0))

    out, attn = pl.pallas_call(
        kernel,
        out_shape=(
            jax.ShapeDtypeStruct((B, S, D), q.dtype),
            jax.ShapeDtypeStruct((B, num_heads, S, S), jnp.float32),
        ),
        grid_spec=pltpu.PrefetchScalarGridSpec(
            num_scalar_prefetch=0,
            grid=(num_blocks,),
            in_specs=[
                batched(), batched(), batched(),            # q, k, v
                full2d((D, D)), full2d((1, D)),             # wq, bq
                full2d((D, D)), full2d((1, D)),             # wk, bk
                full2d((D, D)), full2d((1, D)),             # wv, bv
                full2d((D, D)), full2d((1, D)),             # wo, bo
            ],
            out_specs=[
                batched(),
                pl.BlockSpec((batch_block, num_heads, S, S),
                             lambda i: (i, 0, 0, 0)),
            ],
            scratch_shapes=[
                pltpu.VMEM((batch_block, S, D), jnp.float32),  # q projection
                pltpu.VMEM((batch_block, S, D), jnp.float32),  # k projection
                pltpu.VMEM((batch_block, S, D), jnp.float32),  # v projection
                pltpu.VMEM((batch_block, S, D), jnp.float32),  # merged context
            ],
        ),
        compiler_params=pltpu.CompilerParams(
            dimension_semantics=("parallel",),
            vmem_limit_bytes=32 * 1024 * 1024,
        ),
    )(q, k, v, wq, bq, wk, bk, wv, bv, wo, bo)
    return out, attn


def _reference(q, k, v, params, num_heads):
    """Pure-JAX reference mirroring the PyTorch module (for verification)."""
    B, S, D = q.shape
    dh = D // num_heads
    wq, bq, wk, bk, wv, bv, wo, bo = params

    def split(x):
        return x.reshape(B, S, num_heads, dh).transpose(0, 2, 1, 3)

    qs = split(q @ wq + bq)
    ks = split(k @ wk + bk)
    vs = split(v @ wv + bv)
    logits = jnp.einsum("bhqd,bhkd->bhqk", qs, ks) / jnp.sqrt(jnp.float32(dh))
    attn = jax.nn.softmax(logits, axis=-1)
    ctx = jnp.einsum("bhqk,bhkd->bhqd", attn, vs)
    ctx = ctx.transpose(0, 2, 1, 3).reshape(B, S, D)
    return ctx @ wo + bo, attn


if __name__ == "__main__":
    B, S, D, H = 2, 8, 32, 4

    key = jax.random.PRNGKey(0)
    keys = jax.random.split(key, 12)
    q = jax.random.normal(keys[0], (B, S, D), dtype=jnp.float32)
    k = jax.random.normal(keys[1], (B, S, D), dtype=jnp.float32)
    v = jax.random.normal(keys[2], (B, S, D), dtype=jnp.float32)

    def lin_init(kw, kb, fan_in, fan_out):
        # nn.Linear-style uniform init; note: y = x @ W + b (W already "transposed").
        bound = 1.0 / np.sqrt(fan_in)
        w = jax.random.uniform(kw, (fan_in, fan_out), jnp.float32, -bound, bound)
        b = jax.random.uniform(kb, (fan_out,), jnp.float32, -bound, bound)
        return w, b

    wq, bq = lin_init(keys[3], keys[4], D, D)
    wk, bk = lin_init(keys[5], keys[6], D, D)
    wv, bv = lin_init(keys[7], keys[8], D, D)
    wo, bo = lin_init(keys[9], keys[10], D, D)
    params = (wq, bq, wk, bk, wv, bv, wo, bo)

    out, attn = multi_head_self_attention(q, k, v, params, num_heads=H)
    jax.block_until_ready((out, attn))

    ref_out, ref_attn = _reference(q, k, v, params, num_heads=H)
    # Tolerance 1e-4: approx (EUP) reciprocal + one Newton step in the softmax.
    np.testing.assert_allclose(np.asarray(out), np.asarray(ref_out), atol=1e-4, rtol=1e-4)
    np.testing.assert_allclose(np.asarray(attn), np.asarray(ref_attn), atol=1e-4, rtol=1e-4)

    print("KERNEL_OK")
</pallas_src>

<mosaic_0001>
module attributes {stable_mosaic.version = 11 : i64} {
  func.func @_mhsa_kernel(%arg0: i32, %arg1: memref<2x8x32xf32, #tpu.memory_space<vmem>>, %arg2: memref<2x8x32xf32, #tpu.memory_space<vmem>>, %arg3: memref<2x8x32xf32, #tpu.memory_space<vmem>>, %arg4: memref<32x32xf32, #tpu.memory_space<vmem>>, %arg5: memref<1x32xf32, #tpu.memory_space<vmem>>, %arg6: memref<32x32xf32, #tpu.memory_space<vmem>>, %arg7: memref<1x32xf32, #tpu.memory_space<vmem>>, %arg8: memref<32x32xf32, #tpu.memory_space<vmem>>, %arg9: memref<1x32xf32, #tpu.memory_space<vmem>>, %arg10: memref<32x32xf32, #tpu.memory_space<vmem>>, %arg11: memref<1x32xf32, #tpu.memory_space<vmem>>, %arg12: memref<2x8x32xf32, #tpu.memory_space<vmem>>, %arg13: memref<2x4x8x8xf32, #tpu.memory_space<vmem>>, %arg14: memref<2x8x32xf32, #tpu.memory_space<vmem>>, %arg15: memref<2x8x32xf32, #tpu.memory_space<vmem>>, %arg16: memref<2x8x32xf32, #tpu.memory_space<vmem>>, %arg17: memref<2x8x32xf32, #tpu.memory_space<vmem>>) attributes {dimension_semantics = [#tpu.dimension_semantics<parallel>], iteration_bounds = array<i64: 1>, scalar_prefetch = 0 : i64, scratch_operands = 4 : i64, tpu.core_type = #tpu.core_type<tc>, window_params = [{transform_indices = @transform_0, window_bounds = array<i64: 2, 8, 32>}, {transform_indices = @transform_1, window_bounds = array<i64: 2, 8, 32>}, {transform_indices = @transform_2, window_bounds = array<i64: 2, 8, 32>}, {pipeline_mode = #tpu.pipeline_mode<synchronous>, transform_indices = @transform_3, window_bounds = array<i64: 32, 32>}, {pipeline_mode = #tpu.pipeline_mode<synchronous>, transform_indices = @transform_4, window_bounds = array<i64: 1, 32>}, {pipeline_mode = #tpu.pipeline_mode<synchronous>, transform_indices = @transform_5, window_bounds = array<i64: 32, 32>}, {pipeline_mode = #tpu.pipeline_mode<synchronous>, transform_indices = @transform_6, window_bounds = array<i64: 1, 32>}, {pipeline_mode = #tpu.pipeline_mode<synchronous>, transform_indices = @transform_7, window_bounds = array<i64: 32, 32>}, {pipeline_mode = #tpu.pipeline_mode<synchronous>, transform_indices = @transform_8, window_bounds = array<i64: 1, 32>}, {pipeline_mode = #tpu.pipeline_mode<synchronous>, transform_indices = @transform_9, window_bounds = array<i64: 32, 32>}, {pipeline_mode = #tpu.pipeline_mode<synchronous>, transform_indices = @transform_10, window_bounds = array<i64: 1, 32>}, {transform_indices = @transform_11, window_bounds = array<i64: 2, 8, 32>}, {transform_indices = @transform_12, window_bounds = array<i64: 2, 4, 8, 8>}]} {
    %c0 = arith.constant 0 : index
    %c0_0 = arith.constant 0 : index
    %0 = vector.load %arg4[%c0, %c0_0] : memref<32x32xf32, #tpu.memory_space<vmem>>, vector<32x32xf32>
    %c0_1 = arith.constant 0 : index
    %c0_2 = arith.constant 0 : index
    %1 = vector.load %arg6[%c0_1, %c0_2] : memref<32x32xf32, #tpu.memory_space<vmem>>, vector<32x32xf32>
    %c0_3 = arith.constant 0 : index
    %c0_4 = arith.constant 0 : index
    %2 = vector.load %arg8[%c0_3, %c0_4] : memref<32x32xf32, #tpu.memory_space<vmem>>, vector<32x32xf32>
    %c0_5 = arith.constant 0 : index
    %c0_6 = arith.constant 0 : index
    %3 = vector.load %arg10[%c0_5, %c0_6] : memref<32x32xf32, #tpu.memory_space<vmem>>, vector<32x32xf32>
    %c0_7 = arith.constant 0 : index
    %c0_8 = arith.constant 0 : index
    %4 = vector.load %arg5[%c0_7, %c0_8] : memref<1x32xf32, #tpu.memory_space<vmem>>, vector<1x32xf32>
    %c0_9 = arith.constant 0 : index
    %c0_10 = arith.constant 0 : index
    %5 = vector.load %arg7[%c0_9, %c0_10] : memref<1x32xf32, #tpu.memory_space<vmem>>, vector<1x32xf32>
    %c0_11 = arith.constant 0 : index
    %c0_12 = arith.constant 0 : index
    %6 = vector.load %arg9[%c0_11, %c0_12] : memref<1x32xf32, #tpu.memory_space<vmem>>, vector<1x32xf32>
    %c0_13 = arith.constant 0 : index
    %c0_14 = arith.constant 0 : index
    %7 = vector.load %arg11[%c0_13, %c0_14] : memref<1x32xf32, #tpu.memory_space<vmem>>, vector<1x32xf32>
    %c0_15 = arith.constant 0 : index
    %c0_16 = arith.constant 0 : index
    %c0_17 = arith.constant 0 : index
    %8 = vector.load %arg1[%c0_15, %c0_16, %c0_17] : memref<2x8x32xf32, #tpu.memory_space<vmem>>, vector<1x8x32xf32>
    %9 = vector.shape_cast %8 : vector<1x8x32xf32> to vector<8x32xf32>
    %c0_18 = arith.constant 0 : index
    %c0_19 = arith.constant 0 : index
    %c0_20 = arith.constant 0 : index
    %10 = vector.load %arg2[%c0_18, %c0_19, %c0_20] : memref<2x8x32xf32, #tpu.memory_space<vmem>>, vector<1x8x32xf32>
    %11 = vector.shape_cast %10 : vector<1x8x32xf32> to vector<8x32xf32>
    %c0_21 = arith.constant 0 : index
    %c0_22 = arith.constant 0 : index
    %c0_23 = arith.constant 0 : index
    %12 = vector.load %arg3[%c0_21, %c0_22, %c0_23] : memref<2x8x32xf32, #tpu.memory_space<vmem>>, vector<1x8x32xf32>
    %13 = vector.shape_cast %12 : vector<1x8x32xf32> to vector<8x32xf32>
    %cst = arith.constant dense<0.000000e+00> : vector<8x32xf32>
    %14 = tpu.matmul %9, %0, %cst {dimension_numbers = #tpu.dot_dimension_numbers<[1], [0], [0], [1], [0, 0, 1, 1], [], []>} : vector<8x32xf32>, vector<32x32xf32>, vector<8x32xf32> -> vector<8x32xf32>
    %15 = vector.broadcast %4 : vector<1x32xf32> to vector<8x32xf32>
    %16 = arith.addf %14, %15 : vector<8x32xf32>
    %cst_24 = arith.constant 0.353553385 : f32
    %17 = vector.broadcast %cst_24 : f32 to vector<8x32xf32>
    %18 = arith.mulf %16, %17 : vector<8x32xf32>
    %c0_25 = arith.constant 0 : index
    %c0_26 = arith.constant 0 : index
    %c0_27 = arith.constant 0 : index
    %19 = vector.load %arg14[%c0_25, %c0_26, %c0_27] : memref<2x8x32xf32, #tpu.memory_space<vmem>>, vector<1x8x32xf32>
    %20 = vector.shape_cast %19 : vector<1x8x32xf32> to vector<8x32xf32>
    %21 = vector.shape_cast %18 : vector<8x32xf32> to vector<1x8x32xf32>
    tpu.vector_store %arg14[%c0_25, %c0_26, %c0_27], %21 {strides = array<i32>} : memref<2x8x32xf32, #tpu.memory_space<vmem>>, vector<1x8x32xf32>,
    %cst_28 = arith.constant dense<0.000000e+00> : vector<8x32xf32>
    %22 = tpu.matmul %11, %1, %cst_28 {dimension_numbers = #tpu.dot_dimension_numbers<[1], [0], [0], [1], [0, 0, 1, 1], [], []>} : vector<8x32xf32>, vector<32x32xf32>, vector<8x32xf32> -> vector<8x32xf32>
    %23 = vector.broadcast %5 : vector<1x32xf32> to vector<8x32xf32>
    %24 = arith.addf %22, %23 : vector<8x32xf32>
    %c0_29 = arith.constant 0 : index
    %c0_30 = arith.constant 0 : index
    %c0_31 = arith.constant 0 : index
    %25 = vector.load %arg15[%c0_29, %c0_30, %c0_31] : memref<2x8x32xf32, #tpu.memory_space<vmem>>, vector<1x8x32xf32>
    %26 = vector.shape_cast %25 : vector<1x8x32xf32> to vector<8x32xf32>
    %27 = vector.shape_cast %24 : vector<8x32xf32> to vector<1x8x32xf32>
    tpu.vector_store %arg15[%c0_29, %c0_30, %c0_31], %27 {strides = array<i32>} : memref<2x8x32xf32, #tpu.memory_space<vmem>>, vector<1x8x32xf32>,
    %cst_32 = arith.constant dense<0.000000e+00> : vector<8x32xf32>
    %28 = tpu.matmul %13, %2, %cst_32 {dimension_numbers = #tpu.dot_dimension_numbers<[1], [0], [0], [1], [0, 0, 1, 1], [], []>} : vector<8x32xf32>, vector<32x32xf32>, vector<8x32xf32> -> vector<8x32xf32>
    %29 = vector.broadcast %6 : vector<1x32xf32> to vector<8x32xf32>
    %30 = arith.addf %28, %29 : vector<8x32xf32>
    %c0_33 = arith.constant 0 : index
    %c0_34 = arith.constant 0 : index
    %c0_35 = arith.constant 0 : index
    %31 = vector.load %arg16[%c0_33, %c0_34, %c0_35] : memref<2x8x32xf32, #tpu.memory_space<vmem>>, vector<1x8x32xf32>
    %32 = vector.shape_cast %31 : vector<1x8x32xf32> to vector<8x32xf32>
    %33 = vector.shape_cast %30 : vector<8x32xf32> to vector<1x8x32xf32>
    tpu.vector_store %arg16[%c0_33, %c0_34, %c0_35], %33 {strides = array<i32>} : memref<2x8x32xf32, #tpu.memory_space<vmem>>, vector<1x8x32xf32>,
    %c1 = arith.constant 1 : index
    %c0_36 = arith.constant 0 : index
    %c0_37 = arith.constant 0 : index
    %34 = vector.load %arg1[%c1, %c0_36, %c0_37] : memref<2x8x32xf32, #tpu.memory_space<vmem>>, vector<1x8x32xf32>
    %35 = vector.shape_cast %34 : vector<1x8x32xf32> to vector<8x32xf32>
    %c1_38 = arith.constant 1 : index
    %c0_39 = arith.constant 0 : index
    %c0_40 = arith.constant 0 : index
    %36 = vector.load %arg2[%c1_38, %c0_39, %c0_40] : memref<2x8x32xf32, #tpu.memory_space<vmem>>, vector<1x8x32xf32>
    %37 = vector.shape_cast %36 : vector<1x8x32xf32> to vector<8x32xf32>
    %c1_41 = arith.constant 1 : index
    %c0_42 = arith.constant 0 : index
    %c0_43 = arith.constant 0 : index
    %38 = vector.load %arg3[%c1_41, %c0_42, %c0_43] : memref<2x8x32xf32, #tpu.memory_space<vmem>>, vector<1x8x32xf32>
    %39 = vector.shape_cast %38 : vector<1x8x32xf32> to vector<8x32xf32>
    %cst_44 = arith.constant dense<0.000000e+00> : vector<8x32xf32>
    %40 = tpu.matmul %35, %0, %cst_44 {dimension_numbers = #tpu.dot_dimension_numbers<[1], [0], [0], [1], [0, 0, 1, 1], [], []>} : vector<8x32xf32>, vector<32x32xf32>, vector<8x32xf32> -> vector<8x32xf32>
    %41 = vector.broadcast %4 : vector<1x32xf32> to vector<8x32xf32>
    %42 = arith.addf %40, %41 : vector<8x32xf32>
    %cst_45 = arith.constant 0.353553385 : f32
    %43 = vector.broadcast %cst_45 : f32 to vector<8x32xf32>
    %44 = arith.mulf %42, %43 : vector<8x32xf32>
    %c1_46 = arith.constant 1 : index
    %c0_47 = arith.constant 0 : index
    %c0_48 = arith.constant 0 : index
    %45 = vector.load %arg14[%c1_46, %c0_47, %c0_48] : memref<2x8x32xf32, #tpu.memory_space<vmem>>, vector<1x8x32xf32>
    %46 = vector.shape_cast %45 : vector<1x8x32xf32> to vector<8x32xf32>
    %47 = vector.shape_cast %44 : vector<8x32xf32> to vector<1x8x32xf32>
    tpu.vector_store %arg14[%c1_46, %c0_47, %c0_48], %47 {strides = array<i32>} : memref<2x8x32xf32, #tpu.memory_space<vmem>>, vector<1x8x32xf32>,
    %cst_49 = arith.constant dense<0.000000e+00> : vector<8x32xf32>
    %48 = tpu.matmul %37, %1, %cst_49 {dimension_numbers = #tpu.dot_dimension_numbers<[1], [0], [0], [1], [0, 0, 1, 1], [], []>} : vector<8x32xf32>, vector<32x32xf32>, vector<8x32xf32> -> vector<8x32xf32>
    %49 = vector.broadcast %5 : vector<1x32xf32> to vector<8x32xf32>
    %50 = arith.addf %48, %49 : vector<8x32xf32>
    %c1_50 = arith.constant 1 : index
    %c0_51 = arith.constant 0 : index
    %c0_52 = arith.constant 0 : index
    %51 = vector.load %arg15[%c1_50, %c0_51, %c0_52] : memref<2x8x32xf32, #tpu.memory_space<vmem>>, vector<1x8x32xf32>
    %52 = vector.shape_cast %51 : vector<1x8x32xf32> to vector<8x32xf32>
    %53 = vector.shape_cast %50 : vector<8x32xf32> to vector<1x8x32xf32>
    tpu.vector_store %arg15[%c1_50, %c0_51, %c0_52], %53 {strides = array<i32>} : memref<2x8x32xf32, #tpu.memory_space<vmem>>, vector<1x8x32xf32>,
    %cst_53 = arith.constant dense<0.000000e+00> : vector<8x32xf32>
    %54 = tpu.matmul %39, %2, %cst_53 {dimension_numbers = #tpu.dot_dimension_numbers<[1], [0], [0], [1], [0, 0, 1, 1], [], []>} : vector<8x32xf32>, vector<32x32xf32>, vector<8x32xf32> -> vector<8x32xf32>
    %55 = vector.broadcast %6 : vector<1x32xf32> to vector<8x32xf32>
    %56 = arith.addf %54, %55 : vector<8x32xf32>
    %c1_54 = arith.constant 1 : index
    %c0_55 = arith.constant 0 : index
    %c0_56 = arith.constant 0 : index
    %57 = vector.load %arg16[%c1_54, %c0_55, %c0_56] : memref<2x8x32xf32, #tpu.memory_space<vmem>>, vector<1x8x32xf32>
    %58 = vector.shape_cast %57 : vector<1x8x32xf32> to vector<8x32xf32>
    %59 = vector.shape_cast %56 : vector<8x32xf32> to vector<1x8x32xf32>
    tpu.vector_store %arg16[%c1_54, %c0_55, %c0_56], %59 {strides = array<i32>} : memref<2x8x32xf32, #tpu.memory_space<vmem>>, vector<1x8x32xf32>,
    %c0_57 = arith.constant 0 : index
    %c0_58 = arith.constant 0 : index
    %c0_59 = arith.constant 0 : index
    %60 = vector.load %arg14[%c0_57, %c0_58, %c0_59] : memref<2x8x32xf32, #tpu.memory_space<vmem>>, vector<2x8x8xf32>
    %c0_60 = arith.constant 0 : index
    %c0_61 = arith.constant 0 : index
    %c0_62 = arith.constant 0 : index
    %61 = vector.load %arg15[%c0_60, %c0_61, %c0_62] : memref<2x8x32xf32, #tpu.memory_space<vmem>>, vector<2x8x8xf32>
    %c0_63 = arith.constant 0 : index
    %c0_64 = arith.constant 0 : index
    %c0_65 = arith.constant 0 : index
    %62 = vector.load %arg16[%c0_63, %c0_64, %c0_65] : memref<2x8x32xf32, #tpu.memory_space<vmem>>, vector<2x8x8xf32>
    %cst_66 = arith.constant dense<0.000000e+00> : vector<2x8x8xf32>
    %63 = tpu.matmul %60, %61, %cst_66 {dimension_numbers = #tpu.dot_dimension_numbers<[2], [2], [1], [1], [0, 0, 0, 1, 1, 1], [0], [0]>} : vector<2x8x8xf32>, vector<2x8x8xf32>, vector<2x8x8xf32> -> vector<2x8x8xf32>
    %cst_67 = arith.constant dense<0xFF800000> : vector<2x8xf32>
    %64 = vector.multi_reduction <maximumf>, %63, %cst_67 [2] : vector<2x8x8xf32> to vector<2x8xf32>
    %65 = vector.shape_cast %64 : vector<2x8xf32> to vector<2x8x1xf32>
    %66 = vector.broadcast %65 : vector<2x8x1xf32> to vector<2x8x8xf32>
    %67 = arith.subf %63, %66 : vector<2x8x8xf32>
    %68 = math.exp %67 : vector<2x8x8xf32>
    %cst_68 = arith.constant dense<0.000000e+00> : vector<2x8xf32>
    %69 = vector.multi_reduction <add>, %68, %cst_68 [2] : vector<2x8x8xf32> to vector<2x8xf32>
    %70 = vector.shape_cast %69 : vector<2x8xf32> to vector<2x8x1xf32>
    %71 = tpu.reciprocal %70 {approx = true} : vector<2x8x1xf32> -> vector<2x8x1xf32>
    %72 = arith.mulf %70, %71 : vector<2x8x1xf32>
    %cst_69 = arith.constant 2.000000e+00 : f32
    %73 = vector.broadcast %cst_69 : f32 to vector<2x8x1xf32>
    %74 = arith.subf %73, %72 : vector<2x8x1xf32>
    %75 = arith.mulf %71, %74 : vector<2x8x1xf32>
    %76 = vector.broadcast %75 : vector<2x8x1xf32> to vector<2x8x8xf32>
    %77 = arith.mulf %68, %76 : vector<2x8x8xf32>
    %c0_70 = arith.constant 0 : index
    %c0_71 = arith.constant 0 : index
    %c0_72 = arith.constant 0 : index
    %c0_73 = arith.constant 0 : index
    %78 = vector.load %arg13[%c0_70, %c0_71, %c0_72, %c0_73] : memref<2x4x8x8xf32, #tpu.memory_space<vmem>>, vector<2x1x8x8xf32>
    %79 = vector.shape_cast %78 : vector<2x1x8x8xf32> to vector<2x8x8xf32>
    %80 = vector.shape_cast %77 : vector<2x8x8xf32> to vector<2x1x8x8xf32>
    tpu.vector_store %arg13[%c0_70, %c0_71, %c0_72, %c0_73], %80 {strides = array<i32>} : memref<2x4x8x8xf32, #tpu.memory_space<vmem>>, vector<2x1x8x8xf32>,
    %cst_74 = arith.constant dense<0.000000e+00> : vector<2x8x8xf32>
    %81 = tpu.matmul %77, %62, %cst_74 {dimension_numbers = #tpu.dot_dimension_numbers<[2], [1], [1], [2], [0, 0, 0, 1, 1, 2], [0], [0]>} : vector<2x8x8xf32>, vector<2x8x8xf32>, vector<2x8x8xf32> -> vector<2x8x8xf32>
    %c0_75 = arith.constant 0 : index
    %c0_76 = arith.constant 0 : index
    %c0_77 = arith.constant 0 : index
    %82 = vector.load %arg17[%c0_75, %c0_76, %c0_77] : memref<2x8x32xf32, #tpu.memory_space<vmem>>, vector<2x8x8xf32>
    tpu.vector_store %arg17[%c0_75, %c0_76, %c0_77], %81 {strides = array<i32>} : memref<2x8x32xf32, #tpu.memory_space<vmem>>, vector<2x8x8xf32>,
    %c0_78 = arith.constant 0 : index
    %c0_79 = arith.constant 0 : index
    %c8 = arith.constant 8 : index
    %83 = vector.load %arg14[%c0_78, %c0_79, %c8] : memref<2x8x32xf32, #tpu.memory_space<vmem>>, vector<2x8x8xf32>
    %c0_80 = arith.constant 0 : index
    %c0_81 = arith.constant 0 : index
    %c8_82 = arith.constant 8 : index
    %84 = vector.load %arg15[%c0_80, %c0_81, %c8_82] : memref<2x8x32xf32, #tpu.memory_space<vmem>>, vector<2x8x8xf32>
    %c0_83 = arith.constant 0 : index
    %c0_84 = arith.constant 0 : index
    %c8_85 = arith.constant 8 : index
    %85 = vector.load %arg16[%c0_83, %c0_84, %c8_85] : memref<2x8x32xf32, #tpu.memory_space<vmem>>, vector<2x8x8xf32>
    %cst_86 = arith.constant dense<0.000000e+00> : vector<2x8x8xf32>
    %86 = tpu.matmul %83, %84, %cst_86 {dimension_numbers = #tpu.dot_dimension_numbers<[2], [2], [1], [1], [0, 0, 0, 1, 1, 1], [0], [0]>} : vector<2x8x8xf32>, vector<2x8x8xf32>, vector<2x8x8xf32> -> vector<2x8x8xf32>
    %cst_87 = arith.constant dense<0xFF800000> : vector<2x8xf32>
    %87 = vector.multi_reduction <maximumf>, %86, %cst_87 [2] : vector<2x8x8xf32> to vector<2x8xf32>
    %88 = vector.shape_cast %87 : vector<2x8xf32> to vector<2x8x1xf32>
    %89 = vector.broadcast %88 : vector<2x8x1xf32> to vector<2x8x8xf32>
    %90 = arith.subf %86, %89 : vector<2x8x8xf32>
    %91 = math.exp %90 : vector<2x8x8xf32>
    %cst_88 = arith.constant dense<0.000000e+00> : vector<2x8xf32>
    %92 = vector.multi_reduction <add>, %91, %cst_88 [2] : vector<2x8x8xf32> to vector<2x8xf32>
    %93 = vector.shape_cast %92 : vector<2x8xf32> to vector<2x8x1xf32>
    %94 = tpu.reciprocal %93 {approx = true} : vector<2x8x1xf32> -> vector<2x8x1xf32>
    %95 = arith.mulf %93, %94 : vector<2x8x1xf32>
    %cst_89 = arith.constant 2.000000e+00 : f32
    %96 = vector.broadcast %cst_89 : f32 to vector<2x8x1xf32>
    %97 = arith.subf %96, %95 : vector<2x8x1xf32>
    %98 = arith.mulf %94, %97 : vector<2x8x1xf32>
    %99 = vector.broadcast %98 : vector<2x8x1xf32> to vector<2x8x8xf32>
    %100 = arith.mulf %91, %99 : vector<2x8x8xf32>
    %c0_90 = arith.constant 0 : index
    %c1_91 = arith.constant 1 : index
    %c0_92 = arith.constant 0 : index
    %c0_93 = arith.constant 0 : index
    %101 = vector.load %arg13[%c0_90, %c1_91, %c0_92, %c0_93] : memref<2x4x8x8xf32, #tpu.memory_space<vmem>>, vector<2x1x8x8xf32>
    %102 = vector.shape_cast %101 : vector<2x1x8x8xf32> to vector<2x8x8xf32>
    %103 = vector.shape_cast %100 : vector<2x8x8xf32> to vector<2x1x8x8xf32>
    tpu.vector_store %arg13[%c0_90, %c1_91, %c0_92, %c0_93], %103 {strides = array<i32>} : memref<2x4x8x8xf32, #tpu.memory_space<vmem>>, vector<2x1x8x8xf32>,
    %cst_94 = arith.constant dense<0.000000e+00> : vector<2x8x8xf32>
    %104 = tpu.matmul %100, %85, %cst_94 {dimension_numbers = #tpu.dot_dimension_numbers<[2], [1], [1], [2], [0, 0, 0, 1, 1, 2], [0], [0]>} : vector<2x8x8xf32>, vector<2x8x8xf32>, vector<2x8x8xf32> -> vector<2x8x8xf32>
    %c0_95 = arith.constant 0 : index
    %c0_96 = arith.constant 0 : index
    %c8_97 = arith.constant 8 : index
    %105 = vector.load %arg17[%c0_95, %c0_96, %c8_97] : memref<2x8x32xf32, #tpu.memory_space<vmem>>, vector<2x8x8xf32>
    tpu.vector_store %arg17[%c0_95, %c0_96, %c8_97], %104 {strides = array<i32>} : memref<2x8x32xf32, #tpu.memory_space<vmem>>, vector<2x8x8xf32>,
    %c0_98 = arith.constant 0 : index
    %c0_99 = arith.constant 0 : index
    %c16 = arith.constant 16 : index
    %106 = vector.load %arg14[%c0_98, %c0_99, %c16] : memref<2x8x32xf32, #tpu.memory_space<vmem>>, vector<2x8x8xf32>
    %c0_100 = arith.constant 0 : index
    %c0_101 = arith.constant 0 : index
    %c16_102 = arith.constant 16 : index
    %107 = vector.load %arg15[%c0_100, %c0_101, %c16_102] : memref<2x8x32xf32, #tpu.memory_space<vmem>>, vector<2x8x8xf32>
    %c0_103 = arith.constant 0 : index
    %c0_104 = arith.constant 0 : index
    %c16_105 = arith.constant 16 : index
    %108 = vector.load %arg16[%c0_103, %c0_104, %c16_105] : memref<2x8x32xf32, #tpu.memory_space<vmem>>, vector<2x8x8xf32>
    %cst_106 = arith.constant dense<0.000000e+00> : vector<2x8x8xf32>
    %109 = tpu.matmul %106, %107, %cst_106 {dimension_numbers = #tpu.dot_dimension_numbers<[2], [2], [1], [1], [0, 0, 0, 1, 1, 1], [0], [0]>} : vector<2x8x8xf32>, vector<2x8x8xf32>, vector<2x8x8xf32> -> vector<2x8x8xf32>
    %cst_107 = arith.constant dense<0xFF800000> : vector<2x8xf32>
    %110 = vector.multi_reduction <maximumf>, %109, %cst_107 [2] : vector<2x8x8xf32> to vector<2x8xf32>
    %111 = vector.shape_cast %110 : vector<2x8xf32> to vector<2x8x1xf32>
    %112 = vector.broadcast %111 : vector<2x8x1xf32> to vector<2x8x8xf32>
    %113 = arith.subf %109, %112 : vector<2x8x8xf32>
    %114 = math.exp %113 : vector<2x8x8xf32>
    %cst_108 = arith.constant dense<0.000000e+00> : vector<2x8xf32>
    %115 = vector.multi_reduction <add>, %114, %cst_108 [2] : vector<2x8x8xf32> to vector<2x8xf32>
    %116 = vector.shape_cast %115 : vector<2x8xf32> to vector<2x8x1xf32>
    %117 = tpu.reciprocal %116 {approx = true} : vector<2x8x1xf32> -> vector<2x8x1xf32>
    %118 = arith.mulf %116, %117 : vector<2x8x1xf32>
    %cst_109 = arith.constant 2.000000e+00 : f32
    %119 = vector.broadcast %cst_109 : f32 to vector<2x8x1xf32>
    %120 = arith.subf %119, %118 : vector<2x8x1xf32>
    %121 = arith.mulf %117, %120 : vector<2x8x1xf32>
    %122 = vector.broadcast %121 : vector<2x8x1xf32> to vector<2x8x8xf32>
    %123 = arith.mulf %114, %122 : vector<2x8x8xf32>
    %c0_110 = arith.constant 0 : index
    %c2 = arith.constant 2 : index
    %c0_111 = arith.constant 0 : index
    %c0_112 = arith.constant 0 : index
    %124 = vector.load %arg13[%c0_110, %c2, %c0_111, %c0_112] : memref<2x4x8x8xf32, #tpu.memory_space<vmem>>, vector<2x1x8x8xf32>
    %125 = vector.shape_cast %124 : vector<2x1x8x8xf32> to vector<2x8x8xf32>
    %126 = vector.shape_cast %123 : vector<2x8x8xf32> to vector<2x1x8x8xf32>
    tpu.vector_store %arg13[%c0_110, %c2, %c0_111, %c0_112], %126 {strides = array<i32>} : memref<2x4x8x8xf32, #tpu.memory_space<vmem>>, vector<2x1x8x8xf32>,
    %cst_113 = arith.constant dense<0.000000e+00> : vector<2x8x8xf32>
    %127 = tpu.matmul %123, %108, %cst_113 {dimension_numbers = #tpu.dot_dimension_numbers<[2], [1], [1], [2], [0, 0, 0, 1, 1, 2], [0], [0]>} : vector<2x8x8xf32>, vector<2x8x8xf32>, vector<2x8x8xf32> -> vector<2x8x8xf32>
    %c0_114 = arith.constant 0 : index
    %c0_115 = arith.constant 0 : index
    %c16_116 = arith.constant 16 : index
    %128 = vector.load %arg17[%c0_114, %c0_115, %c16_116] : memref<2x8x32xf32, #tpu.memory_space<vmem>>, vector<2x8x8xf32>
    tpu.vector_store %arg17[%c0_114, %c0_115, %c16_116], %127 {strides = array<i32>} : memref<2x8x32xf32, #tpu.memory_space<vmem>>, vector<2x8x8xf32>,
    %c0_117 = arith.constant 0 : index
    %c0_118 = arith.constant 0 : index
    %c24 = arith.constant 24 : index
    %129 = vector.load %arg14[%c0_117, %c0_118, %c24] : memref<2x8x32xf32, #tpu.memory_space<vmem>>, vector<2x8x8xf32>
    %c0_119 = arith.constant 0 : index
    %c0_120 = arith.constant 0 : index
    %c24_121 = arith.constant 24 : index
    %130 = vector.load %arg15[%c0_119, %c0_120, %c24_121] : memref<2x8x32xf32, #tpu.memory_space<vmem>>, vector<2x8x8xf32>
    %c0_122 = arith.constant 0 : index
    %c0_123 = arith.constant 0 : index
    %c24_124 = arith.constant 24 : index
    %131 = vector.load %arg16[%c0_122, %c0_123, %c24_124] : memref<2x8x32xf32, #tpu.memory_space<vmem>>, vector<2x8x8xf32>
    %cst_125 = arith.constant dense<0.000000e+00> : vector<2x8x8xf32>
    %132 = tpu.matmul %129, %130, %cst_125 {dimension_numbers = #tpu.dot_dimension_numbers<[2], [2], [1], [1], [0, 0, 0, 1, 1, 1], [0], [0]>} : vector<2x8x8xf32>, vector<2x8x8xf32>, vector<2x8x8xf32> -> vector<2x8x8xf32>
    %cst_126 = arith.constant dense<0xFF800000> : vector<2x8xf32>
    %133 = vector.multi_reduction <maximumf>, %132, %cst_126 [2] : vector<2x8x8xf32> to vector<2x8xf32>
    %134 = vector.shape_cast %133 : vector<2x8xf32> to vector<2x8x1xf32>
    %135 = vector.broadcast %134 : vector<2x8x1xf32> to vector<2x8x8xf32>
    %136 = arith.subf %132, %135 : vector<2x8x8xf32>
    %137 = math.exp %136 : vector<2x8x8xf32>
    %cst_127 = arith.constant dense<0.000000e+00> : vector<2x8xf32>
    %138 = vector.multi_reduction <add>, %137, %cst_127 [2] : vector<2x8x8xf32> to vector<2x8xf32>
    %139 = vector.shape_cast %138 : vector<2x8xf32> to vector<2x8x1xf32>
    %140 = tpu.reciprocal %139 {approx = true} : vector<2x8x1xf32> -> vector<2x8x1xf32>
    %141 = arith.mulf %139, %140 : vector<2x8x1xf32>
    %cst_128 = arith.constant 2.000000e+00 : f32
    %142 = vector.broadcast %cst_128 : f32 to vector<2x8x1xf32>
    %143 = arith.subf %142, %141 : vector<2x8x1xf32>
    %144 = arith.mulf %140, %143 : vector<2x8x1xf32>
    %145 = vector.broadcast %144 : vector<2x8x1xf32> to vector<2x8x8xf32>
    %146 = arith.mulf %137, %145 : vector<2x8x8xf32>
    %c0_129 = arith.constant 0 : index
    %c3 = arith.constant 3 : index
    %c0_130 = arith.constant 0 : index
    %c0_131 = arith.constant 0 : index
    %147 = vector.load %arg13[%c0_129, %c3, %c0_130, %c0_131] : memref<2x4x8x8xf32, #tpu.memory_space<vmem>>, vector<2x1x8x8xf32>
    %148 = vector.shape_cast %147 : vector<2x1x8x8xf32> to vector<2x8x8xf32>
    %149 = vector.shape_cast %146 : vector<2x8x8xf32> to vector<2x1x8x8xf32>
    tpu.vector_store %arg13[%c0_129, %c3, %c0_130, %c0_131], %149 {strides = array<i32>} : memref<2x4x8x8xf32, #tpu.memory_space<vmem>>, vector<2x1x8x8xf32>,
    %cst_132 = arith.constant dense<0.000000e+00> : vector<2x8x8xf32>
    %150 = tpu.matmul %146, %131, %cst_132 {dimension_numbers = #tpu.dot_dimension_numbers<[2], [1], [1], [2], [0, 0, 0, 1, 1, 2], [0], [0]>} : vector<2x8x8xf32>, vector<2x8x8xf32>, vector<2x8x8xf32> -> vector<2x8x8xf32>
    %c0_133 = arith.constant 0 : index
    %c0_134 = arith.constant 0 : index
    %c24_135 = arith.constant 24 : index
    %151 = vector.load %arg17[%c0_133, %c0_134, %c24_135] : memref<2x8x32xf32, #tpu.memory_space<vmem>>, vector<2x8x8xf32>
    tpu.vector_store %arg17[%c0_133, %c0_134, %c24_135], %150 {strides = array<i32>} : memref<2x8x32xf32, #tpu.memory_space<vmem>>, vector<2x8x8xf32>,
    %c0_136 = arith.constant 0 : index
    %c0_137 = arith.constant 0 : index
    %c0_138 = arith.constant 0 : index
    %152 = vector.load %arg17[%c0_136, %c0_137, %c0_138] : memref<2x8x32xf32, #tpu.memory_space<vmem>>, vector<1x8x32xf32>
    %153 = vector.shape_cast %152 : vector<1x8x32xf32> to vector<8x32xf32>
    %cst_139 = arith.constant dense<0.000000e+00> : vector<8x32xf32>
    %154 = tpu.matmul %153, %3, %cst_139 {dimension_numbers = #tpu.dot_dimension_numbers<[1], [0], [0], [1], [0, 0, 1, 1], [], []>} : vector<8x32xf32>, vector<32x32xf32>, vector<8x32xf32> -> vector<8x32xf32>
    %155 = vector.broadcast %7 : vector<1x32xf32> to vector<8x32xf32>
    %156 = arith.addf %154, %155 : vector<8x32xf32>
    %c0_140 = arith.constant 0 : index
    %c0_141 = arith.constant 0 : index
    %c0_142 = arith.constant 0 : index
    %157 = vector.load %arg12[%c0_140, %c0_141, %c0_142] : memref<2x8x32xf32, #tpu.memory_space<vmem>>, vector<1x8x32xf32>
    %158 = vector.shape_cast %157 : vector<1x8x32xf32> to vector<8x32xf32>
    %159 = vector.shape_cast %156 : vector<8x32xf32> to vector<1x8x32xf32>
    tpu.vector_store %arg12[%c0_140, %c0_141, %c0_142], %159 {strides = array<i32>} : memref<2x8x32xf32, #tpu.memory_space<vmem>>, vector<1x8x32xf32>,
    %c1_143 = arith.constant 1 : index
    %c0_144 = arith.constant 0 : index
    %c0_145 = arith.constant 0 : index
    %160 = vector.load %arg17[%c1_143, %c0_144, %c0_145] : memref<2x8x32xf32, #tpu.memory_space<vmem>>, vector<1x8x32xf32>
    %161 = vector.shape_cast %160 : vector<1x8x32xf32> to vector<8x32xf32>
    %cst_146 = arith.constant dense<0.000000e+00> : vector<8x32xf32>
    %162 = tpu.matmul %161, %3, %cst_146 {dimension_numbers = #tpu.dot_dimension_numbers<[1], [0], [0], [1], [0, 0, 1, 1], [], []>} : vector<8x32xf32>, vector<32x32xf32>, vector<8x32xf32> -> vector<8x32xf32>
    %163 = vector.broadcast %7 : vector<1x32xf32> to vector<8x32xf32>
    %164 = arith.addf %162, %163 : vector<8x32xf32>
    %c1_147 = arith.constant 1 : index
    %c0_148 = arith.constant 0 : index
    %c0_149 = arith.constant 0 : index
    %165 = vector.load %arg12[%c1_147, %c0_148, %c0_149] : memref<2x8x32xf32, #tpu.memory_space<vmem>>, vector<1x8x32xf32>
    %166 = vector.shape_cast %165 : vector<1x8x32xf32> to vector<8x32xf32>
    %167 = vector.shape_cast %164 : vector<8x32xf32> to vector<1x8x32xf32>
    tpu.vector_store %arg12[%c1_147, %c0_148, %c0_149], %167 {strides = array<i32>} : memref<2x8x32xf32, #tpu.memory_space<vmem>>, vector<1x8x32xf32>,
    return
  }
  func.func @transform_0(%arg0: i32) -> (i32, i32, i32) {
    %c0_i32 = arith.constant 0 : i32
    %c0_i32_0 = arith.constant 0 : i32
    %c0_i32_1 = arith.constant 0 : i32
    return %arg0, %c0_i32, %c0_i32_0 : i32, i32, i32
  }
  func.func @transform_1(%arg0: i32) -> (i32, i32, i32) {
    %c0_i32 = arith.constant 0 : i32
    %c0_i32_0 = arith.constant 0 : i32
    %c0_i32_1 = arith.constant 0 : i32
    return %arg0, %c0_i32, %c0_i32_0 : i32, i32, i32
  }
  func.func @transform_2(%arg0: i32) -> (i32, i32, i32) {
    %c0_i32 = arith.constant 0 : i32
    %c0_i32_0 = arith.constant 0 : i32
    %c0_i32_1 = arith.constant 0 : i32
    return %arg0, %c0_i32, %c0_i32_0 : i32, i32, i32
  }
  func.func @transform_3(%arg0: i32) -> (i32, i32) {
    %c0_i32 = arith.constant 0 : i32
    %c0_i32_0 = arith.constant 0 : i32
    %c0_i32_1 = arith.constant 0 : i32
    return %c0_i32, %c0_i32_0 : i32, i32
  }
  func.func @transform_4(%arg0: i32) -> (i32, i32) {
    %c0_i32 = arith.constant 0 : i32
    %c0_i32_0 = arith.constant 0 : i32
    %c0_i32_1 = arith.constant 0 : i32
    return %c0_i32, %c0_i32_0 : i32, i32
  }
  func.func @transform_5(%arg0: i32) -> (i32, i32) {
    %c0_i32 = arith.constant 0 : i32
    %c0_i32_0 = arith.constant 0 : i32
    %c0_i32_1 = arith.constant 0 : i32
    return %c0_i32, %c0_i32_0 : i32, i32
  }
  func.func @transform_6(%arg0: i32) -> (i32, i32) {
    %c0_i32 = arith.constant 0 : i32
    %c0_i32_0 = arith.constant 0 : i32
    %c0_i32_1 = arith.constant 0 : i32
    return %c0_i32, %c0_i32_0 : i32, i32
  }
  func.func @transform_7(%arg0: i32) -> (i32, i32) {
    %c0_i32 = arith.constant 0 : i32
    %c0_i32_0 = arith.constant 0 : i32
    %c0_i32_1 = arith.constant 0 : i32
    return %c0_i32, %c0_i32_0 : i32, i32
  }
  func.func @transform_8(%arg0: i32) -> (i32, i32) {
    %c0_i32 = arith.constant 0 : i32
    %c0_i32_0 = arith.constant 0 : i32
    %c0_i32_1 = arith.constant 0 : i32
    return %c0_i32, %c0_i32_0 : i32, i32
  }
  func.func @transform_9(%arg0: i32) -> (i32, i32) {
    %c0_i32 = arith.constant 0 : i32
    %c0_i32_0 = arith.constant 0 : i32
    %c0_i32_1 = arith.constant 0 : i32
    return %c0_i32, %c0_i32_0 : i32, i32
  }
  func.func @transform_10(%arg0: i32) -> (i32, i32) {
    %c0_i32 = arith.constant 0 : i32
    %c0_i32_0 = arith.constant 0 : i32
    %c0_i32_1 = arith.constant 0 : i32
    return %c0_i32, %c0_i32_0 : i32, i32
  }
  func.func @transform_11(%arg0: i32) -> (i32, i32, i32) {
    %c0_i32 = arith.constant 0 : i32
    %c0_i32_0 = arith.constant 0 : i32
    %c0_i32_1 = arith.constant 0 : i32
    return %arg0, %c0_i32, %c0_i32_0 : i32, i32, i32
  }
  func.func @transform_12(%arg0: i32) -> (i32, i32, i32, i32) {
    %c0_i32 = arith.constant 0 : i32
    %c0_i32_0 = arith.constant 0 : i32
    %c0_i32_1 = arith.constant 0 : i32
    %c0_i32_2 = arith.constant 0 : i32
    return %arg0, %c0_i32, %c0_i32_0, %c0_i32_1 : i32, i32, i32, i32
  }
}

</mosaic_0001>

<bundles_post_ra>
// kernel: tpu_custom_call.1
= control target key start
LH: loop header
LB: loop body
LE: loop exit
PB: predicated region body
PF: predicated region fallthrough
CT: control target
= control target key end

     0   :  { %18 = vsyncpa [#allocation7], 0  ;;  %s1647_s0 = inlined_call_operand.hbm [shape: f32[2,8,32], index: 0, kind: input, shape index: {}]   ;;  %s1648_s1 = inlined_call_operand.hbm [shape: f32[2,8,32], index: 1, kind: input, shape index: {}]   ;;  %s1649_s2 = inlined_call_operand.hbm [shape: f32[2,8,32], index: 2, kind: input, shape index: {}]   ;;  %s1650_s3 = inlined_call_operand.hbm [shape: f32[32,32], index: 3, kind: input, shape index: {}]   ;;  %s1651_s4 = inlined_call_operand.vmem [shape: f32[1,32], index: 4, kind: input, shape index: {}]   ;;  %s1652_s5 = inlined_call_operand.hbm [shape: f32[32,32], index: 5, kind: input, shape index: {}]   ;;  %s1653_s6 = inlined_call_operand.vmem [shape: f32[1,32], index: 6, kind: input, shape index: {}]   ;;  %s1654_s7 = inlined_call_operand.hbm [shape: f32[32,32], index: 7, kind: input, shape index: {}]   ;;  %s1655_s8 = inlined_call_operand.vmem [shape: f32[1,32], index: 8, kind: input, shape index: {}]   ;;  %s1656_s9 = inlined_call_operand.hbm [shape: f32[32,32], index: 9, kind: input, shape index: {}]   ;;  %s1657_s10 = inlined_call_operand.vmem [shape: f32[1,32], index: 10, kind: input, shape index: {}]   ;;  %s1658_s11 = inlined_call_operand.hbm [shape: f32[2,8,32], index: 11, kind: output, shape index: {0}]   ;;  %s1659_s12 = inlined_call_operand.hbm [shape: f32[2,4,8,8], index: 12, kind: output, shape index: {1}]  }
   0x1   :  { %19 = vsyncpa [#allocation10], 0 }
   0x2   :  { %20 = vsyncpa [#allocation13], 0 }
   0x3   :  { %21 = vsyncpa [#allocation16], 0 }
   0x4   :  { %22 = vsyncpa [#allocation8], 0 }
   0x5   :  { %23 = vsyncpa [#allocation20], 0  ;;  %s41_s23 = sshll.u32 %s1648_s1, 4  ;;  %s1384_s24 = smov [#allocation9]   ;;  %s42_s23 = int_to_ptr.hbm [resolvable:$true] %s41_s23 }
   0x6   :  { %s43_s25 = sshll.u32 %s1384_s24, 4  ;;  %s67_s28 = sshll.u32 %s1650_s3, 4  ;;  %s44_s25 = int_to_ptr.vmem [resolvable:$true] %s43_s25  ;;  %s68_s28 = int_to_ptr.hbm [resolvable:$true] %s67_s28 }
   0x7   :  { %s1385_s29 = smov 128   ;;  %s1386_s30 = smov 8  }
   0x8   :  { %49 = dma.hbm_to_vmem [thread:$0]  %s42_s23, 256, %s44_s25, [#allocation10], %s1385_s29, %s1385_s29, %s1386_s30  }
   0x9   :  { %s1387_s13 = smov [#allocation12]   ;;  %s97_s1 = sshll.u32 %s1654_s7, 4  ;;  %s98_s1 = int_to_ptr.hbm [resolvable:$true] %s97_s1 }
   0xa   :  { %s69_s14 = sshll.u32 %s1387_s13, 4  ;;  %s28_s18 = sshll.u32 %s1647_s0, 4  ;;  %s70_s14 = int_to_ptr.vmem [resolvable:$true] %s69_s14  ;;  %s29_s18 = int_to_ptr.hbm [resolvable:$true] %s28_s18 }
   0xb   :  { %75 = dma.hbm_to_vmem [thread:$0]  %s68_s28, 512, %s70_s14, [#allocation13], %s1385_s29, %s1385_s29, %s1386_s30  }
   0xc   :  { %s1388_s19 = smov [#allocation15]   ;;  %s1389_s21 = smov [#allocation6]  }
   0xd   :  { %s99_s20 = sshll.u32 %s1388_s19, 4  ;;  %s30_s7 = sshll.u32 %s1389_s21, 4  ;;  %s100_s20 = int_to_ptr.vmem [resolvable:$true] %s99_s20  ;;  %s31_s7 = int_to_ptr.vmem [resolvable:$true] %s30_s7 }
   0xe   :  { %105 = dma.hbm_to_vmem [thread:$0]  %s98_s1, 512, %s100_s20, [#allocation16], %s1385_s29, %s1385_s29, %s1386_s30  }
   0xf   :  { %s54_s24 = sshll.u32 %s1649_s2, 4  ;;  %s82_s26 = sshll.u32 %s1652_s5, 4  ;;  %s55_s24 = int_to_ptr.hbm [resolvable:$true] %s54_s24  ;;  %s83_s26 = int_to_ptr.hbm [resolvable:$true] %s82_s26 }
  0x10   :  { %36 = dma.hbm_to_vmem [thread:$0]  %s29_s18, 256, %s31_s7, [#allocation7], %s1385_s29, %s1385_s29, %s1386_s30  }
  0x11   :  { %s1390_s27 = smov [#allocation11]   ;;  %s1391_s13 = smov [#allocation14]  }
  0x12   :  { %s56_s28 = sshll.u32 %s1390_s27, 4  ;;  %s84_s2 = sshll.u32 %s1391_s13, 4  ;;  %s57_s28 = int_to_ptr.vmem [resolvable:$true] %s56_s28  ;;  %s85_s2 = int_to_ptr.vmem [resolvable:$true] %s84_s2 }
  0x13   :  { %62 = dma.hbm_to_vmem [thread:$0]  %s55_s24, 256, %s57_s28, [#allocation10], %s1385_s29, %s1385_s29, %s1386_s30  }
  0x14   :  { %s112_s16 = sshll.u32 %s1656_s9, 4  ;;  %s1392_s5 = smov [#allocation17]   ;;  %s113_s16 = int_to_ptr.hbm [resolvable:$true] %s112_s16 }
  0x15   :  { %90 = dma.hbm_to_vmem [thread:$0]  %s83_s26, 512, %s85_s2, [#allocation13], %s1385_s29, %s1385_s29, %s1386_s30  }
  0x16   :  { %s114_s1 = sshll.u32 %s1392_s5, 4  ;;  %s115_s1 = int_to_ptr.vmem [resolvable:$true] %s114_s1 }
  0x17   :  { %120 = dma.hbm_to_vmem [thread:$0]  %s113_s16, 512, %s115_s1, [#allocation16], %s1385_s29, %s1385_s29, %s1386_s30  }
  0x18   :  { %1372 = dma.done.wait [#allocation7], 256  }
  0x19   :  { %1373 = vsyncadd [#allocation7], 4294967040 }
  0x1a   :  { %1374 = dma.done.wait [#allocation10], 512  }
  0x1b   :  { %1375 = vsyncadd [#allocation10], 4294966784 }
  0x1c   :  { %1376 = dma.done.wait [#allocation13], 1024  }
  0x1d   :  { %1377 = vsyncadd [#allocation13], 4294966272 }
  0x1e   :  { %1378 = dma.done.wait [#allocation16], 1024  }
  0x1f   :  { %1379 = vsyncadd [#allocation16], 4294966272  ;;  %v154_v0 = vld [vmem:[#allocation12 + $0x18] sm:$0xff]  ;;  %v153_v2 = vld [vmem:[#allocation12 + $0x10] sm:$0xff]  ;;  %vm177_vm0 = vcmask 261120   ;;  %vm345_vm1 = vcmask 64512  }
  0x20   :  { %v158_v1 = vld [vmem:[#allocation14 + $0x18] sm:$0xff]  ;;  %193 = vmatpush.msra.mxu0 %v154_v0  ;;  %v157_v3 = vld [vmem:[#allocation14 + $0x10] sm:$0xff]  ;;  %278 = vmatpush.msra.mxu3 %v154_v0  ;;  %v152_v4 = vld [vmem:[#allocation12 + $0x8] sm:$0xff]  ;;  %s1395_s19 = smov 104   ;;  %s1397_s7 = smov 24   ;;  %vm635_vm2 = vcmask 130112  }
  0x21   :  { %221 = vmatpush.msra.mxu1 %v158_v1  ;;  %v156_v5 = vld [vmem:[#allocation14 + $0x8] sm:$0xff]  ;;  %v151_v6 = vld [vmem:[#allocation12] sm:$0xff]  ;;  %v171_v8 = vld [vmem:[#allocation6] sm:$0xff]  ;;  %vm797_vm3 = vcmask 195712   ;;  %vm959_vm4 = vcmask 261312   ;;  %s1398_s22 = smov [#allocation19]  }
  0x22   :  { %194 = vmatpush.msra.mxu0 %v153_v2  ;;  %v155_v7 = vld [vmem:[#allocation14] sm:$0xff]  ;;  %279 = vmatpush.msra.mxu3 %v153_v2  ;;  %v162_v10 = vld [vmem:[#allocation15 + $0x18] sm:$0xff]  ;;  %v260_v12 = vld [vmem:[#allocation9 + $0x8] sm:$0xff]  ;;  %s1034_s23 = sshll.u32 %s1398_s22, 4  ;;  %s1036_s25 = sshll.u32 %s1659_s12, 4  ;;  %s1035_s23 = int_to_ptr.vmem [resolvable:$true] %s1034_s23  ;;  %s1037_s25 = int_to_ptr.hbm [resolvable:$true] %s1036_s25 }
  0x23   :  { %222 = vmatpush.msra.mxu1 %v157_v3  ;;  %v172_v9 = vld [vmem:[#allocation9] sm:$0xff]  ;;  %248 = vmatpush.msra.mxu2 %v162_v10  ;;  %v258_v11 = vld [vmem:[#allocation6 + $0x8] sm:$0xff]  ;;  %v161_v13 = vld [vmem:[#allocation15 + $0x10] sm:$0xff]  ;;  %s1399_s28 = smov [#allocation18]   ;;  %s1023_s15 = sshll.u32 %s1658_s11, 4  ;;  %s1024_s15 = int_to_ptr.hbm [resolvable:$true] %s1023_s15 }
  0x24   :  { %195 = vmatpush.msra.mxu0 %v152_v4  ;;  %280 = vmatpush.msra.mxu3 %v152_v4  ;;  %v160_v14 = vld [vmem:[#allocation15 + $0x8] sm:$0xff]  ;;  %v159_v15 = vld [vmem:[#allocation15] sm:$0xff]  ;;  %v173_v16 = vld [vmem:[#allocation11] sm:$0xff]  ;;  %s1021_s13 = sshll.u32 %s1399_s28, 4  ;;  %s1022_s13 = int_to_ptr.vmem [resolvable:$true] %s1021_s13 }
  0x25   :  { %223 = vmatpush.msra.mxu1 %v156_v5  ;;  %249 = vmatpush.msra.mxu2 %v161_v13  ;;  %v1120_v17 = vld [vmem:[%s1651_s4] ss:$0 sm:$0xff]  ;;  %s1393_s4 = smov 112   ;;  %v262_v33 = vld [vmem:[#allocation11 + $0x8] sm:$0xff] }
  0x26   :  { %196 = vmatpush.msra.mxu0 %v151_v6  ;;  %281 = vmatpush.msra.mxu3 %v151_v6  ;;  %v1121_v18 = vld [vmem:[%s1653_s6] ss:$0 sm:$0xff]  ;;  %s1394_s6 = smov 120  }
  0x27   :  { %224 = vmatpush.msra.mxu1 %v155_v7  ;;  %1057 = vmatmul.msk.f32.vlgmr.msra.gmra.mxu0 %vm177_vm0, %v171_v8  ;;  %v1122_v34 = vld [vmem:[%s1655_s8] ss:$0 sm:$0xff]  ;;  %s1396_s8 = smov 16  }
  0x28   :  { %1058 = vmatmul.msk.f32.vlgmr.msra.gmra.mxu1 %vm177_vm0, %v172_v9  ;;  %304 = vmatpush.msrb.mxu0 %v158_v1 }
  0x29   :  { %1060 = vmatmul.msk.f32.vlgmr.msra.gmra.mxu3 %vm177_vm0, %v258_v11  ;;  %329 = vmatpush.msrb.mxu1 %v162_v10 }
  0x2a   :  { %305 = vmatpush.msrb.mxu0 %v157_v3  ;;  %250 = vmatpush.msra.mxu2 %v160_v14 }
  0x2b   :  { %330 = vmatpush.msrb.mxu1 %v161_v13 }
  0x2c   :  { %306 = vmatpush.msrb.mxu0 %v156_v5  ;;  %251 = vmatpush.msra.mxu2 %v159_v15 }
  0x2d   :  { %331 = vmatpush.msrb.mxu1 %v160_v14  ;;  %1059 = vmatmul.msk.f32.vlgmr.msra.gmra.mxu2 %vm177_vm0, %v173_v16 }
  0x2e   :  { %307 = vmatpush.msrb.mxu0 %v155_v7 }
  0x2f   :  { %1061 = vmatmul.msk.f32.vlgmr.msrb.gmra.mxu0 %vm177_vm0, %v260_v12  ;;  %332 = vmatpush.msrb.mxu1 %v159_v15 }
  0x30   :  { %1062 = vmatmul.msk.f32.vlgmr.msrb.gmra.mxu1 %vm177_vm0, %v262_v33 }
  0xa4   :  { %v198_v19 = vpop.f32.mrf.mxu0 }
  0xa5   :  { %v226_v20 = vpop.f32.mrf.mxu1  ;;  %v199_v21 = vadd.f32 %v1120_v17, %v198_v19 }
  0xa6   :  { %v227_v22 = vadd.f32 %v1121_v18, %v226_v20 }
  0xa7   :  { %v201_v23 = vmul.f32 0.35355338, %v199_v21 }
  0xa8   :  { %229 = vst.msk [vmem:[#allocation3] sm:$0xff] %vm177_vm0, %v227_v22 }
  0xa9   :  { %202 = vst.msk [vmem:[#allocation2] sm:$0xff] %vm177_vm0, %v201_v23 }
  0xac   :  { %v283_v24 = vpop.f32.mrf.mxu3  ;;  %v309_v25 = vpop.f32.mrf.mxu0 }
  0xad   :  { %v284_v26 = vadd.f32 %v1120_v17, %v283_v24  ;;  %v310_v27 = vadd.f32 %v1121_v18, %v309_v25  ;;  %v334_v54 = vpop.f32.mrf.mxu1 }
  0xae   :  { %v335_v55 = vadd.f32 %v1122_v34, %v334_v54 }
  0xaf   :  { %v640_v28 = vld [vmem:[#allocation3] sm:$0xff]  ;;  %v286_v29 = vmul.f32 0.35355338, %v284_v26  ;;  %313 = vst.msk [vmem:[#allocation3 + $0x8] sm:$0xff] %vm177_vm0, %v310_v27 }
  0xb0   :  { %648 = vrot.lane.b32.xlu2 %v640_v28, %s1393_s4  ;;  %486 = vrot.lane.b32.xlu0 %v640_v28, %s1394_s6  ;;  %v476_v30 = vld [vmem:[#allocation2] sm:$0xff]  ;;  %v253_v35 = vpop.f32.mrf.mxu2  ;;  %338 = vst.msk [vmem:[#allocation4 + $0x8] sm:$0xff] %vm177_vm0, %v335_v55 }
  0xb1   :  { %1063 = vmatpush.xpose.msk.msrb.mxu2 %vm345_vm1, %v640_v28  ;;  %288 = vst.msk [vmem:[#allocation2 + $0x8] sm:$0xff] %vm177_vm0, %v286_v29  ;;  %483 = vrot.lane.b32.xlu1 %v476_v30, %s1394_s6  ;;  %v254_v36 = vadd.f32 %v1122_v34, %v253_v35 }
  0xb3   :  { %256 = vst.msk [vmem:[#allocation4] sm:$0xff] %vm177_vm0, %v254_v36 }
  0xb4   :  { %1064 = vmatmul.msk.f32.vlgmr.msrb.gmra.mxu2 %vm345_vm1, %v476_v30 }
  0xb6   :  { %v641_v31 = vld [vmem:[#allocation3 + $0x8] sm:$0xff] }
  0xb7   :  { %1065 = vmatpush.xpose.msk.msrb.mxu3 %vm345_vm1, %v641_v31  ;;  %v344_v56 = vld [vmem:[#allocation4 + $0x8] sm:$0xff] }
  0xb8   :  { %678 = vrot.lane.b32.xlu2 %v641_v31, %s1393_s4  ;;  %516 = vrot.lane.b32.xlu0 %v641_v31, %s1394_s6  ;;  %v477_v32 = vld [vmem:[#allocation2 + $0x8] sm:$0xff] }
  0xb9   :  { %513 = vrot.lane.b32.xlu1 %v477_v32, %s1394_s6  ;;  %469 = vmatpush.msra.mxu1 %v344_v56 }
  0xba   :  { %1066 = vmatmul.msk.f32.vlgmr.msrb.gmra.mxu3 %vm345_vm1, %v477_v32  ;;  %v343_v53 = vld [vmem:[#allocation4] sm:$0xff] }
  0xbb   :  { %446 = vmatpush.msra.mxu0 %v343_v53  ;;  %v1558_v57 = vpack.i.bf16 %v344_v56, %v343_v53 }
  0xc0   :  { %810 = vrot.lane.b32.xlu2 %v640_v28, %s1395_s19  ;;  %645 = vrot.lane.b32.xlu0 %v476_v30, %s1393_s4 }
  0xc1   :  { %675 = vrot.lane.b32.xlu1 %v477_v32, %s1393_s4 }
  0xc8   :  { %837 = vrot.lane.b32.xlu2 %v477_v32, %s1395_s19  ;;  %840 = vrot.lane.b32.xlu0 %v641_v31, %s1395_s19 }
  0xc9   :  { %807 = vrot.lane.b32.xlu1 %v476_v30, %s1395_s19 }
 0x10a   :  { %v649_v37 = vpop.permute.xlu2 %648 }
 0x112   :  { %v679_v38 = vpop.permute.xlu2 %678 }
 0x11a   :  { %v811_v41 = vpop.permute.xlu2 %810 }
 0x122   :  { %v487_v39 = vpop.permute.xlu0 %486  ;;  %v838_v50 = vpop.permute.xlu2 %837 }
 0x123   :  { %1069 = vmatpush.xpose.msk.msra.mxu2 %vm345_vm1, %v487_v39  ;;  %v484_v40 = vpop.permute.xlu1 %483 }
 0x126   :  { %1070 = vmatmul.msk.f32.vlgmr.msra.gmra.mxu2 %vm345_vm1, %v484_v40 }
 0x127   :  { %1075 = vmatpush.xpose.msk.msrb.mxu2 %vm345_vm1, %v649_v37 }
 0x12a   :  { %v517_v42 = vpop.permute.xlu0 %516 }
 0x12b   :  { %1081 = vmatpush.xpose.msk.msra.mxu2 %vm345_vm1, %v811_v41  ;;  %1071 = vmatpush.xpose.msk.msra.mxu3 %vm345_vm1, %v517_v42  ;;  %v514_v43 = vpop.permute.xlu1 %513 }
 0x12e   :  { %1072 = vmatmul.msk.f32.vlgmr.msra.gmra.mxu3 %vm345_vm1, %v514_v43 }
 0x12f   :  { %1077 = vmatpush.xpose.msk.msrb.mxu3 %vm345_vm1, %v679_v38 }
 0x132   :  { %v646_v44 = vpop.permute.xlu0 %645 }
 0x133   :  { %1076 = vmatmul.msk.f32.vlgmr.msrb.gmra.mxu2 %vm345_vm1, %v646_v44  ;;  %v676_v45 = vpop.permute.xlu1 %675 }
 0x136   :  { %1078 = vmatmul.msk.f32.vlgmr.msrb.gmra.mxu3 %vm345_vm1, %v676_v45 }
 0x137   :  { %v369_v46 = vpop.f32.mrf.mxu2 }
 0x138   :  { %v398_v47 = vsel %vm345_vm1, %v369_v46, -inf }
 0x139   :  { %399 = vmax.xlane.f32.xlu0 %v398_v47 }
 0x13a   :  { %v841_v48 = vpop.permute.xlu0 %840 }
 0x13b   :  { %1083 = vmatpush.xpose.msk.msra.mxu3 %vm345_vm1, %v841_v48  ;;  %v808_v49 = vpop.permute.xlu1 %807 }
 0x13c   :  { %1082 = vmatmul.msk.f32.vlgmr.msra.gmra.mxu2 %vm345_vm1, %v808_v49 }
 0x13d   :  { %v395_v51 = vpop.f32.mrf.mxu3 }
 0x13e   :  { %1084 = vmatmul.msk.f32.vlgmr.msra.gmra.mxu3 %vm345_vm1, %v838_v50  ;;  %v401_v52 = vsel %vm345_vm1, %v395_v51, -inf }
 0x13f   :  { %402 = vmax.xlane.f32.xlu1 %v401_v52 }
 0x1a9   :  { %v509_v58 = vpop.f32.mrf.mxu2 }
 0x1aa   :  { %v542_v59 = vsel %vm345_vm1, %v509_v58, -inf }
 0x1ab   :  { %543 = vmax.xlane.f32.xlu2 %v542_v59 }
 0x1ac   :  { %v400_v60 = vpop.xlane.xlu0 %399 }
 0x1ad   :  { %v404_v61 = vsub.f32 %v369_v46, %v400_v60 }
 0x1af   :  { %v406_v0 = vmul.f32 1.442695, %v404_v61 }
 0x1b1   :  { %v539_v62 = vpop.f32.mrf.mxu3  ;;  %1124 = vpow2.f32 %v406_v0 }
 0x1b2   :  { %v545_v63 = vsel %vm345_vm1, %v539_v62, -inf  ;;  %v403_v1 = vpop.xlane.xlu1 %402 }
 0x1b3   :  { %546 = vmax.xlane.f32.xlu2 %v545_v63  ;;  %v405_v4 = vsub.f32 %v395_v51, %v403_v1 }
 0x1b5   :  { %v408_v7 = vmul.f32 1.442695, %v405_v4 }
 0x1b6   :  { %v671_v2 = vpop.f32.mrf.mxu2 }
 0x1b7   :  { %v704_v3 = vsel %vm345_vm1, %v671_v2, -inf  ;;  %v1564_v8 = vpop.eup %1124  ;;  %1126 = vpow2.f32 %v408_v7 }
 0x1b8   :  { %705 = vmax.xlane.f32.xlu0 %v704_v3  ;;  %v410_v13 = vsel %vm345_vm1, %v1564_v8, 0.0 }
 0x1b9   :  { %v701_v5 = vpop.f32.mrf.mxu3 }
 0x1ba   :  { %v707_v6 = vsel %vm345_vm1, %v701_v5, -inf }
 0x1bb   :  { %708 = vmax.xlane.f32.xlu1 %v707_v6 }
 0x1bd   :  { %v1127_v14 = vpop.eup %1126 }
 0x1be   :  { %v413_v15 = vsel %vm345_vm1, %v1127_v14, 0.0 }
 0x1bf   :  { %v833_v9 = vpop.f32.mrf.mxu2 }
 0x1c0   :  { %v866_v11 = vsel %vm345_vm1, %v833_v9, -inf }
 0x1c1   :  { %v863_v10 = vpop.f32.mrf.mxu3  ;;  %867 = vmax.xlane.f32.xlu2 %v866_v11 }
 0x1c2   :  { %v869_v12 = vsel %vm345_vm1, %v863_v10, -inf }
 0x1c3   :  { %870 = vmax.xlane.f32.xlu0 %v869_v12  ;;  %411 = vadd.xlane.f32.xlu1 %v410_v13 }
 0x1c9   :  { %414 = vadd.xlane.f32.xlu2 %v413_v15 }
 0x21e   :  { %v544_v16 = vpop.xlane.xlu2 %543 }
 0x21f   :  { %v548_v17 = vsub.f32 %v509_v58, %v544_v16 }
 0x221   :  { %v550_v18 = vmul.f32 1.442695, %v548_v17 }
 0x223   :  { %1128 = vpow2.f32 %v550_v18 }
 0x226   :  { %v547_v19 = vpop.xlane.xlu2 %546 }
 0x227   :  { %v549_v20 = vsub.f32 %v539_v62, %v547_v19 }
 0x229   :  { %v1571_v21 = vpop.eup %1128  ;;  %v552_v22 = vmul.f32 1.442695, %v549_v20 }
 0x22a   :  { %v554_v23 = vsel %vm345_vm1, %v1571_v21, 0.0 }
 0x22b   :  { %1130 = vpow2.f32 %v552_v22  ;;  %555 = vadd.xlane.f32.xlu0 %v554_v23  ;;  %v706_v24 = vpop.xlane.xlu0 %705 }
 0x22c   :  { %v710_v25 = vsub.f32 %v671_v2, %v706_v24 }
 0x22e   :  { %v712_v26 = vmul.f32 1.442695, %v710_v25  ;;  %v709_v27 = vpop.xlane.xlu1 %708 }
 0x22f   :  { %v711_v28 = vsub.f32 %v701_v5, %v709_v27 }
 0x230   :  { %1132 = vpow2.f32 %v712_v26 }
 0x231   :  { %v1575_v29 = vpop.eup %1130  ;;  %v714_v30 = vmul.f32 1.442695, %v711_v28 }
 0x232   :  { %v557_v31 = vsel %vm345_vm1, %v1575_v29, 0.0 }
 0x233   :  { %1134 = vpow2.f32 %v714_v30  ;;  %558 = vadd.xlane.f32.xlu1 %v557_v31 }
 0x234   :  { %v868_v32 = vpop.xlane.xlu2 %867 }
 0x235   :  { %v872_v34 = vsub.f32 %v833_v9, %v868_v32 }
 0x236   :  { %v1579_v33 = vpop.eup %1132  ;;  %v412_v35 = vpop.xlane.xlu1 %411 }
 0x237   :  { %v871_v36 = vpop.xlane.xlu0 %870  ;;  %1136 = vrcp.f32 %v412_v35  ;;  %v716_v38 = vsel %vm345_vm1, %v1579_v33, 0.0  ;;  %v874_v39 = vmul.f32 1.442695, %v872_v34 }
 0x238   :  { %v873_v37 = vsub.f32 %v863_v10, %v871_v36  ;;  %717 = vadd.xlane.f32.xlu2 %v716_v38 }
 0x239   :  { %v1583_v40 = vpop.eup %1134  ;;  %1138 = vpow2.f32 %v874_v39 }
 0x23a   :  { %v876_v41 = vmul.f32 1.442695, %v873_v37  ;;  %v719_v42 = vsel %vm345_vm1, %v1583_v40, 0.0 }
 0x23b   :  { %720 = vadd.xlane.f32.xlu0 %v719_v42 }
 0x23c   :  { %1140 = vpow2.f32 %v876_v41  ;;  %v415_v44 = vpop.xlane.xlu2 %414 }
 0x23d   :  { %v1137_v43 = vpop.eup %1136  ;;  %1142 = vrcp.f32 %v415_v44 }
 0x23e   :  { %v418_v45 = vmul.f32 %v1137_v43, %v412_v35 }
 0x23f   :  { %v1587_v46 = vpop.eup %1138 }
 0x240   :  { %v420_v47 = vsub.f32 2.0, %v418_v45  ;;  %v878_v49 = vsel %vm345_vm1, %v1587_v46, 0.0 }
 0x241   :  { %879 = vadd.xlane.f32.xlu2 %v878_v49  ;;  %v164_v49 = vld [vmem:[#allocation17 + $0x8] sm:$0xff] }
 0x242   :  { %v1589_v48 = vpop.eup %1140  ;;  %v422_v50 = vmul.f32 %v1137_v43, %v420_v47  ;;  %v166_v47 = vld [vmem:[#allocation17 + $0x18] sm:$0xff] }
 0x243   :  { %v881_v51 = vsel %vm345_vm1, %v1589_v48, 0.0  ;;  %v1143_v52 = vpop.eup %1142  ;;  %981 = vmatpush.msrb.mxu2 %v166_v47  ;;  %1007 = vmatpush.msrb.mxu3 %v166_v47 }
 0x244   :  { %882 = vadd.xlane.f32.xlu0 %v881_v51  ;;  %v424_v53 = vmul.f32 %v1564_v8, %v422_v50  ;;  %v419_v54 = vmul.f32 %v1143_v52, %v415_v44  ;;  %v163_v50 = vld [vmem:[#allocation17] sm:$0xff] }
 0x246   :  { %426 = vst.msk [vmem:[#allocation19] sm:$0xff] %vm345_vm1, %v424_v53  ;;  %1067 = vmatmul.msk.f32.vlgmr.msra.gmra.mxu0 %vm345_vm1, %v424_v53  ;;  %v421_v55 = vsub.f32 2.0, %v419_v54 }
 0x248   :  { %v423_v56 = vmul.f32 %v1143_v52, %v421_v55 }
 0x24a   :  { %v425_v58 = vmul.f32 %v1127_v14, %v423_v56 }
 0x24c   :  { %1106 = vrot.lane.b32.xlu1 %v1558_v57, %s1394_s6  ;;  %427 = vst.msk [vmem:[#allocation19 + $0x20] sm:$0xff] %vm345_vm1, %v425_v58  ;;  %1068 = vmatmul.msk.f32.vlgmr.msra.gmra.mxu1 %vm345_vm1, %v425_v58 }
 0x258   :  { %1116 = vrot.lane.b32.xlu0 %v1558_v57, %s1395_s19 }
 0x259   :  { %1111 = vrot.lane.b32.xlu2 %v1558_v57, %s1393_s4 }
 0x29e   :  { %v556_v59 = vpop.xlane.xlu0 %555 }
 0x29f   :  { %1144 = vrcp.f32 %v556_v59 }
 0x2a5   :  { %v1145_v60 = vpop.eup %1144 }
 0x2a6   :  { %v562_v61 = vmul.f32 %v1145_v60, %v556_v59  ;;  %v559_v62 = vpop.xlane.xlu1 %558 }
 0x2a7   :  { %1146 = vrcp.f32 %v559_v62 }
 0x2a8   :  { %v564_v63 = vsub.f32 2.0, %v562_v61 }
 0x2aa   :  { %v566_v0 = vmul.f32 %v1145_v60, %v564_v63  ;;  %v1123_v60 = vld [vmem:[%s1657_s10] ss:$0 sm:$0xff] }
 0x2ab   :  { %v718_v1 = vpop.xlane.xlu2 %717 }
 0x2ac   :  { %v568_v2 = vmul.f32 %v1571_v21, %v566_v0  ;;  %1148 = vrcp.f32 %v718_v1 }
 0x2ad   :  { %v1147_v3 = vpop.eup %1146 }
 0x2ae   :  { %571 = vst.msk [vmem:[#allocation19 + $0x8] sm:$0xff] %vm345_vm1, %v568_v2  ;;  %v563_v4 = vmul.f32 %v1147_v3, %v559_v62  ;;  %v721_v5 = vpop.xlane.xlu0 %720 }
 0x2af   :  { %1150 = vrcp.f32 %v721_v5 }
 0x2b0   :  { %v565_v6 = vsub.f32 2.0, %v563_v4 }
 0x2b2   :  { %v1149_v57 = vpop.eup %1148  ;;  %v567_v7 = vmul.f32 %v1147_v3, %v565_v6 }
 0x2b3   :  { %v724_v8 = vmul.f32 %v1149_v57, %v718_v1 }
 0x2b4   :  { %v569_v9 = vmul.f32 %v1575_v29, %v567_v7  ;;  %v880_v12 = vpop.xlane.xlu2 %879 }
 0x2b5   :  { %v1151_v10 = vpop.eup %1150  ;;  %v726_v11 = vsub.f32 2.0, %v724_v8  ;;  %1152 = vrcp.f32 %v880_v12 }
 0x2b6   :  { %572 = vst.msk [vmem:[#allocation19 + $0x28] sm:$0xff] %vm345_vm1, %v569_v9  ;;  %v725_v13 = vmul.f32 %v1151_v10, %v721_v5 }
 0x2b7   :  { %v883_v14 = vpop.xlane.xlu0 %882  ;;  %v728_v15 = vmul.f32 %v1149_v57, %v726_v11 }
 0x2b8   :  { %1154 = vrcp.f32 %v883_v14  ;;  %v727_v16 = vsub.f32 2.0, %v725_v13 }
 0x2b9   :  { %v730_v17 = vmul.f32 %v1579_v33, %v728_v15 }
 0x2ba   :  { %v729_v18 = vmul.f32 %v1151_v10, %v727_v16 }
 0x2bb   :  { %733 = vst.msk [vmem:[#allocation19 + $0x10] sm:$0xff] %vm345_vm1, %v730_v17  ;;  %v1153_v19 = vpop.eup %1152 }
 0x2bc   :  { %v731_v20 = vmul.f32 %v1583_v40, %v729_v18  ;;  %v886_v22 = vmul.f32 %v1153_v19, %v880_v12  ;;  %v1112_v24 = vpop.permute.xlu2 %1111 }
 0x2bd   :  { %v1114_v31 = vunpack.i.h.bf16 %v1112_v24  ;;  %v1113_v32 = vunpack.i.l.bf16 %v1112_v24 }
 0x2be   :  { %v1155_v21 = vpop.eup %1154  ;;  %734 = vst.msk [vmem:[#allocation19 + $0x30] sm:$0xff] %vm345_vm1, %v731_v20  ;;  %v1107_v25 = vpop.permute.xlu1 %1106  ;;  %v888_v26 = vsub.f32 2.0, %v886_v22 }
 0x2bf   :  { %v887_v23 = vmul.f32 %v1155_v21, %v883_v14  ;;  %v1109_v27 = vunpack.i.h.bf16 %v1107_v25  ;;  %v1108_v28 = vunpack.i.l.bf16 %v1107_v25 }
 0x2c0   :  { %v890_v30 = vmul.f32 %v1153_v19, %v888_v26 }
 0x2c1   :  { %v889_v29 = vsub.f32 2.0, %v887_v23  ;;  %595 = vmatpush.msrb.mxu0 %v1108_v28  ;;  %622 = vmatpush.msrb.mxu1 %v1109_v27 }
 0x2c2   :  { %1073 = vmatmul.msk.f32.vlgmr.msrb.gmra.mxu0 %vm345_vm1, %v568_v2  ;;  %1074 = vmatmul.msk.f32.vlgmr.msrb.gmra.mxu1 %vm345_vm1, %v569_v9  ;;  %v892_v34 = vmul.f32 %v1587_v46, %v890_v30 }
 0x2c3   :  { %v891_v33 = vmul.f32 %v1155_v21, %v889_v29  ;;  %757 = vmatpush.msra.mxu0 %v1113_v32  ;;  %784 = vmatpush.msra.mxu1 %v1114_v31  ;;  %v448_v35 = vpop.f32.mrf.mxu0 }
 0x2c4   :  { %474 = vst.msk [vmem:[#allocation5] sm:$0xff] %vm345_vm1, %v448_v35 }
 0x2c5   :  { %v893_v36 = vmul.f32 %v1589_v48, %v891_v33  ;;  %895 = vst.msk [vmem:[#allocation19 + $0x18] sm:$0xff] %vm345_vm1, %v892_v34  ;;  %v165_v48 = vld [vmem:[#allocation17 + $0x10] sm:$0xff] }
 0x2c6   :  { %982 = vmatpush.msrb.mxu2 %v165_v48  ;;  %1008 = vmatpush.msrb.mxu3 %v165_v48 }
 0x2c7   :  { %896 = vst.msk [vmem:[#allocation19 + $0x38] sm:$0xff] %vm345_vm1, %v893_v36 }
 0x2c8   :  { %983 = vmatpush.msrb.mxu2 %v164_v49  ;;  %1009 = vmatpush.msrb.mxu3 %v164_v49  ;;  %1042 = dma.vmem_to_hbm [thread:$0]  %s1035_s23, 1024, %s1037_s25, [#allocation20], %s1385_s29, %s1385_s29, %s1386_s30  }
 0x2c9   :  { %v471_v40 = vpop.f32.mrf.mxu1 }
 0x2ca   :  { %v1117_v37 = vpop.permute.xlu0 %1116  ;;  %1079 = vmatmul.msk.f32.vlgmr.msra.gmra.mxu0 %vm345_vm1, %v730_v17  ;;  %1080 = vmatmul.msk.f32.vlgmr.msra.gmra.mxu1 %vm345_vm1, %v731_v20  ;;  %475 = vst.msk [vmem:[#allocation5 + $0x8] sm:$0xff] %vm345_vm1, %v471_v40 }
 0x2cb   :  { %v1119_v38 = vunpack.i.h.bf16 %v1117_v37  ;;  %v1118_v39 = vunpack.i.l.bf16 %v1117_v37  ;;  %984 = vmatpush.msrb.mxu2 %v163_v50  ;;  %1010 = vmatpush.msrb.mxu3 %v163_v50 }
 0x2cd   :  { %919 = vmatpush.msrb.mxu0 %v1118_v39  ;;  %946 = vmatpush.msrb.mxu1 %v1119_v38 }
 0x2d2   :  { %1085 = vmatmul.msk.f32.vlgmr.msrb.gmra.mxu0 %vm345_vm1, %v892_v34  ;;  %1086 = vmatmul.msk.f32.vlgmr.msrb.gmra.mxu1 %vm345_vm1, %v893_v36 }
 0x33f   :  { %v597_v41 = vpop.f32.mrf.mxu0  ;;  %v624_v42 = vpop.f32.mrf.mxu1 }
 0x340   :  { %629 = vrot.lane.b32.xlu1 %v597_v41, %s1386_s30 }
 0x347   :  { %v759_v43 = vpop.f32.mrf.mxu0  ;;  %v786_v44 = vpop.f32.mrf.mxu1 }
 0x348   :  { %631 = vrot.lane.b32.xlu1 %v624_v42, %s1386_s30  ;;  %791 = vrot.lane.b32.xlu0 %v759_v43, %s1396_s8 }
 0x349   :  { %793 = vrot.lane.b32.xlu2 %v786_v44, %s1396_s8 }
 0x34f   :  { %v921_v45 = vpop.f32.mrf.mxu0  ;;  %v948_v46 = vpop.f32.mrf.mxu1 }
 0x350   :  { %955 = vrot.lane.b32.xlu0 %v948_v46, %s1397_s7  ;;  %953 = vrot.lane.b32.xlu1 %v921_v45, %s1397_s7 }
 0x3a3   :  { %v794_v54 = vpop.permute.xlu2 %793 }
 0x3b2   :  { %v630_v51 = vpop.permute.xlu1 %629 }
 0x3b3   :  { %636 = vst.msk [vmem:[#allocation5] sm:$0xff] %vm635_vm2, %v630_v51 }
 0x3ba   :  { %v632_v52 = vpop.permute.xlu1 %631  ;;  %v792_v53 = vpop.permute.xlu0 %791 }
 0x3bb   :  { %637 = vst.msk [vmem:[#allocation5 + $0x8] sm:$0xff] %vm635_vm2, %v632_v52 }
 0x3bc   :  { %798 = vst.msk [vmem:[#allocation5] sm:$0xff] %vm797_vm3, %v792_v53 }
 0x3bd   :  { %799 = vst.msk [vmem:[#allocation5 + $0x8] sm:$0xff] %vm797_vm3, %v794_v54 }
 0x3c2   :  { %v956_v55 = vpop.permute.xlu0 %955  ;;  %v954_v56 = vpop.permute.xlu1 %953 }
 0x3c3   :  { %961 = vst.msk [vmem:[#allocation5 + $0x8] sm:$0xff] %vm959_vm4, %v956_v55 }
 0x3c4   :  { %960 = vst.msk [vmem:[#allocation5] sm:$0xff] %vm959_vm4, %v954_v56 }
 0x3ca   :  { %v991_v58 = vld [vmem:[#allocation5 + $0x8] sm:$0xff] }
 0x3cb   :  { %v962_v59 = vld [vmem:[#allocation5] sm:$0xff]  ;;  %1088 = vmatmul.msk.f32.vlgmr.msrb.gmra.mxu3 %vm177_vm0, %v991_v58 }
 0x3cc   :  { %1087 = vmatmul.msk.f32.vlgmr.msrb.gmra.mxu2 %vm177_vm0, %v962_v59 }
 0x44e   :  { %v1012_v61 = vpop.f32.mrf.mxu3 }
 0x44f   :  { %v986_v62 = vpop.f32.mrf.mxu2  ;;  %v1013_v63 = vadd.f32 %v1123_v60, %v1012_v61 }
 0x450   :  { %v987_v0 = vadd.f32 %v1123_v60, %v986_v62 }
 0x451   :  { %1016 = vst.msk [vmem:[#allocation18 + $0x8] sm:$0xff] %vm177_vm0, %v1013_v63 }
 0x452   :  { %989 = vst.msk [vmem:[#allocation18] sm:$0xff] %vm177_vm0, %v987_v0 }
 0x453   :  { %1029 = dma.vmem_to_hbm [thread:$0]  %s1022_s13, 256, %s1024_s15, [#allocation8], %s1385_s29, %s1385_s29, %s1386_s30  }
 0x454   :  { %1380 = dma.done.wait [#allocation8], 256  }
 0x455   :  { %1381 = vsyncadd [#allocation8], 4294967040 }
 0x456   :  { %1382 = dma.done.wait [#allocation20], 1024  }
 0x457   :  { %1383 = vsyncadd [#allocation20], 4294966272 }
 0x458   :  { %1051 = vsyncpa [#allocation7], 1 }
 0x459   :  { %1052 = vsyncpa [#allocation10], 1 }
 0x45a   :  { %1053 = vsyncpa [#allocation13], 1 }
 0x45b   :  { %1054 = vsyncpa [#allocation16], 1 }
 0x45c   :  { %1055 = vsyncpa [#allocation8], 1 }
 0x45d   :  { %1056 = vsyncpa [#allocation20], 1 }

</bundles_post_ra>
